<compile_context>
chip_gen: v5e
topology: v5e:2x2
jax: 0.10.0
libtpu: 0.0.40
codegen_flags: <defaults>
</compile_context>

<pallas_src>
import jax
import jax.numpy as jnp
from jax.experimental import pallas as pl
from jax.experimental.pallas import tpu as pltpu

LANE = 128     # vreg lane width
SUBLANE = 8    # f32 sublane count


def _round_up(n, m):
    return ((n + m - 1) // m) * m


def mlp_bernoulli_kernel(x_ref, w1_ref, b1_ref, w2_ref, b2_ref, u_ref, out_ref):
    # Hidden layer: Linear + Tanh.  bf16 MXU matmul, f32 accumulate; elementwise in f32.
    x = x_ref[...]                                             # (bb, D_in) bf16
    h = jnp.tanh(
        jnp.dot(x, w1_ref[...], preferred_element_type=jnp.float32) + b1_ref[...]
    )                                                          # (bb, H_pad) f32

    # Output layer: Linear + Sigmoid -> Bernoulli mean in (0, 1).
    logits = (
        jnp.dot(h.astype(jnp.bfloat16), w2_ref[...],
                preferred_element_type=jnp.float32)
        + b2_ref[...]
    )                                                          # (bb, D_out_pad) f32
    mean = jax.nn.sigmoid(logits)

    # Bernoulli draw: sample = 1.0 iff u < mean (u supplied by the wrapper).
    out_ref[...] = (u_ref[...] < mean).astype(out_ref.dtype)


def bernoulli_sampler_forward(x, w1, b1, w2, b2, key, *, block_b=128):
    """mean = sigmoid(tanh(x @ w1 + b1) @ w2 + b2);  return bernoulli(mean)."""
    B, d_in = x.shape
    h = w1.shape[1]
    d_out = w2.shape[1]

    # Lane-pad the "N" dims of both matmuls -> dense MXU columns + unmasked stores.
    h_pad = _round_up(h, LANE)
    d_out_pad = _round_up(d_out, LANE)

    # Batch tiling: block_b rows per grid step (sublane aligned); pad B to a multiple.
    bb = min(block_b, _round_up(B, SUBLANE))
    b_pad = _round_up(B, bb)

    f32, bf16 = jnp.float32, jnp.bfloat16

    # Zero-padding + dtype casts (cheap XLA ops, fused under jit).
    x_p = jnp.zeros((b_pad, d_in), bf16).at[:B].set(x.astype(bf16))
    w1_p = jnp.zeros((d_in, h_pad), bf16).at[:, :h].set(w1.astype(bf16))
    b1_p = jnp.zeros((1, h_pad), f32).at[:, :h].set(b1.astype(f32))
    w2_p = jnp.zeros((h_pad, d_out_pad), bf16).at[:h, :d_out].set(w2.astype(bf16))
    b2_p = jnp.zeros((1, d_out_pad), f32).at[:, :d_out].set(b2.astype(f32))

    # Uniforms for the Bernoulli draw (portable replacement for the TPU HW PRNG).
    u = jax.random.uniform(key, (b_pad, d_out_pad), dtype=f32)

    grid = (b_pad // bb,)
    out = pl.pallas_call(
        mlp_bernoulli_kernel,
        out_shape=jax.ShapeDtypeStruct((b_pad, d_out_pad), f32),
        grid=grid,
        in_specs=[
            pl.BlockSpec((bb, d_in), lambda i: (i, 0)),          # x tile
            pl.BlockSpec((d_in, h_pad), lambda i: (0, 0)),       # w1 (replicated)
            pl.BlockSpec((1, h_pad), lambda i: (0, 0)),          # b1
            pl.BlockSpec((h_pad, d_out_pad), lambda i: (0, 0)),  # w2
            pl.BlockSpec((1, d_out_pad), lambda i: (0, 0)),      # b2
            pl.BlockSpec((bb, d_out_pad), lambda i: (i, 0)),     # uniforms
        ],
        out_specs=pl.BlockSpec((bb, d_out_pad), lambda i: (i, 0)),
        compiler_params=pltpu.CompilerParams(
            dimension_semantics=("parallel",),
        ),
    )(x_p, w1_p, b1_p, w2_p, b2_p, u)

    return out[:B, :d_out]


if __name__ == "__main__":
    # n_units = [32, 64, 16]  ->  Linear(32,64) + Tanh + Linear(64,16) + Sigmoid
    B, D_IN, H, D_OUT = 200, 32, 64, 16   # B=200 exercises batch padding + a 2-step grid

    key = jax.random.PRNGKey(0)
    kx, kw1, kb1, kw2, kb2, ksample = jax.random.split(key, 6)

    x = jax.random.normal(kx, (B, D_IN), dtype=jnp.float32)

    # Deterministic synthetic Gaussian-init parameters, stored as (in, out).
    w1 = 0.1 * jax.random.normal(kw1, (D_IN, H), dtype=jnp.float32)
    b1 = 0.1 * jax.random.normal(kb1, (1, H), dtype=jnp.float32)
    w2 = 0.1 * jax.random.normal(kw2, (H, D_OUT), dtype=jnp.float32)
    b2 = 0.1 * jax.random.normal(kb2, (1, D_OUT), dtype=jnp.float32)

    out = jax.jit(bernoulli_sampler_forward)(x, w1, b1, w2, b2, ksample)
    out = jax.block_until_ready(out)

    assert out.shape == (B, D_OUT)
    assert out.dtype == jnp.float32
    # Samples must be exactly 0.0 or 1.0
    assert bool(jnp.all((out == 0.0) | (out == 1.0)))

    # Sanity: empirical sample rate roughly matches the mean network's output.
    mean_ref = jax.nn.sigmoid(jnp.tanh(x @ w1 + b1) @ w2 + b2)
    assert abs(float(out.mean()) - float(mean_ref.mean())) < 0.05

    print("KERNEL_OK")
</pallas_src>

<mosaic_0001>
module attributes {stable_mosaic.version = 11 : i64} {
  func.func @mlp_bernoulli_kernel(%arg0: i32, %arg1: memref<128x32xbf16, #tpu.memory_space<vmem>>, %arg2: memref<32x128xbf16, #tpu.memory_space<vmem>>, %arg3: memref<1x128xf32, #tpu.memory_space<vmem>>, %arg4: memref<128x128xbf16, #tpu.memory_space<vmem>>, %arg5: memref<1x128xf32, #tpu.memory_space<vmem>>, %arg6: memref<128x128xf32, #tpu.memory_space<vmem>>, %arg7: memref<128x128xf32, #tpu.memory_space<vmem>>) attributes {dimension_semantics = [#tpu.dimension_semantics<parallel>], iteration_bounds = array<i64: 2>, scalar_prefetch = 0 : i64, scratch_operands = 0 : i64, tpu.core_type = #tpu.core_type<tc>, window_params = [{transform_indices = @transform_0, window_bounds = array<i64: 128, 32>}, {pipeline_mode = #tpu.pipeline_mode<synchronous>, transform_indices = @transform_1, window_bounds = array<i64: 32, 128>}, {pipeline_mode = #tpu.pipeline_mode<synchronous>, transform_indices = @transform_2, window_bounds = array<i64: 1, 128>}, {pipeline_mode = #tpu.pipeline_mode<synchronous>, transform_indices = @transform_3, window_bounds = array<i64: 128, 128>}, {pipeline_mode = #tpu.pipeline_mode<synchronous>, transform_indices = @transform_4, window_bounds = array<i64: 1, 128>}, {transform_indices = @transform_5, window_bounds = array<i64: 128, 128>}, {transform_indices = @transform_6, window_bounds = array<i64: 128, 128>}]} {
    %c0 = arith.constant 0 : index
    %c0_0 = arith.constant 0 : index
    %0 = vector.load %arg1[%c0, %c0_0] : memref<128x32xbf16, #tpu.memory_space<vmem>>, vector<128x32xbf16>
    %c0_1 = arith.constant 0 : index
    %c0_2 = arith.constant 0 : index
    %1 = vector.load %arg2[%c0_1, %c0_2] : memref<32x128xbf16, #tpu.memory_space<vmem>>, vector<32x128xbf16>
    %cst = arith.constant dense<0.000000e+00> : vector<128x128xf32>
    %2 = tpu.matmul %0, %1, %cst {dimension_numbers = #tpu.dot_dimension_numbers<[1], [0], [0], [1], [0, 0, 1, 1], [], []>} : vector<128x32xbf16>, vector<32x128xbf16>, vector<128x128xf32> -> vector<128x128xf32>
    %c0_3 = arith.constant 0 : index
    %c0_4 = arith.constant 0 : index
    %3 = vector.load %arg3[%c0_3, %c0_4] : memref<1x128xf32, #tpu.memory_space<vmem>>, vector<1x128xf32>
    %4 = vector.broadcast %3 : vector<1x128xf32> to vector<128x128xf32>
    %5 = arith.addf %2, %4 : vector<128x128xf32>
    %6 = math.tanh %5 : vector<128x128xf32>
    %7 = arith.truncf %6 : vector<128x128xf32> to vector<128x128xbf16>
    %c0_5 = arith.constant 0 : index
    %c0_6 = arith.constant 0 : index
    %8 = vector.load %arg4[%c0_5, %c0_6] : memref<128x128xbf16, #tpu.memory_space<vmem>>, vector<128x128xbf16>
    %cst_7 = arith.constant dense<0.000000e+00> : vector<128x128xf32>
    %9 = tpu.matmul %7, %8, %cst_7 {dimension_numbers = #tpu.dot_dimension_numbers<[1], [0], [0], [1], [0, 0, 1, 1], [], []>} : vector<128x128xbf16>, vector<128x128xbf16>, vector<128x128xf32> -> vector<128x128xf32>
    %c0_8 = arith.constant 0 : index
    %c0_9 = arith.constant 0 : index
    %10 = vector.load %arg5[%c0_8, %c0_9] : memref<1x128xf32, #tpu.memory_space<vmem>>, vector<1x128xf32>
    %11 = vector.broadcast %10 : vector<1x128xf32> to vector<128x128xf32>
    %12 = arith.addf %9, %11 : vector<128x128xf32>
    %13 = arith.negf %12 : vector<128x128xf32>
    %14 = math.exp %13 : vector<128x128xf32>
    %cst_10 = arith.constant 1.000000e+00 : f32
    %15 = vector.broadcast %cst_10 : f32 to vector<128x128xf32>
    %16 = arith.addf %15, %14 : vector<128x128xf32>
    %17 = arith.divf %15, %16 : vector<128x128xf32>
    %c0_11 = arith.constant 0 : index
    %c0_12 = arith.constant 0 : index
    %18 = vector.load %arg6[%c0_11, %c0_12] : memref<128x128xf32, #tpu.memory_space<vmem>>, vector<128x128xf32>
    %19 = arith.cmpf olt, %18, %17 : vector<128x128xf32>
    %20 = arith.extui %19 : vector<128x128xi1> to vector<128x128xi32>
    %21 = arith.sitofp %20 : vector<128x128xi32> to vector<128x128xf32>
    %c0_13 = arith.constant 0 : index
    %c0_14 = arith.constant 0 : index
    %22 = vector.load %arg7[%c0_13, %c0_14] : memref<128x128xf32, #tpu.memory_space<vmem>>, vector<128x128xf32>
    tpu.vector_store %arg7[%c0_13, %c0_14], %21 {strides = array<i32>} : memref<128x128xf32, #tpu.memory_space<vmem>>, vector<128x128xf32>,
    return
  }
  func.func @transform_0(%arg0: i32) -> (i32, i32) {
    %c0_i32 = arith.constant 0 : i32
    %c0_i32_0 = arith.constant 0 : i32
    return %arg0, %c0_i32 : i32, i32
  }
  func.func @transform_1(%arg0: i32) -> (i32, i32) {
    %c0_i32 = arith.constant 0 : i32
    %c0_i32_0 = arith.constant 0 : i32
    %c0_i32_1 = arith.constant 0 : i32
    return %c0_i32, %c0_i32_0 : i32, i32
  }
  func.func @transform_2(%arg0: i32) -> (i32, i32) {
    %c0_i32 = arith.constant 0 : i32
    %c0_i32_0 = arith.constant 0 : i32
    %c0_i32_1 = arith.constant 0 : i32
    return %c0_i32, %c0_i32_0 : i32, i32
  }
  func.func @transform_3(%arg0: i32) -> (i32, i32) {
    %c0_i32 = arith.constant 0 : i32
    %c0_i32_0 = arith.constant 0 : i32
    %c0_i32_1 = arith.constant 0 : i32
    return %c0_i32, %c0_i32_0 : i32, i32
  }
  func.func @transform_4(%arg0: i32) -> (i32, i32) {
    %c0_i32 = arith.constant 0 : i32
    %c0_i32_0 = arith.constant 0 : i32
    %c0_i32_1 = arith.constant 0 : i32
    return %c0_i32, %c0_i32_0 : i32, i32
  }
  func.func @transform_5(%arg0: i32) -> (i32, i32) {
    %c0_i32 = arith.constant 0 : i32
    %c0_i32_0 = arith.constant 0 : i32
    return %arg0, %c0_i32 : i32, i32
  }
  func.func @transform_6(%arg0: i32) -> (i32, i32) {
    %c0_i32 = arith.constant 0 : i32
    %c0_i32_0 = arith.constant 0 : i32
    return %arg0, %c0_i32 : i32, i32
  }
}

</mosaic_0001>

<bundles_post_ra>
// kernel: bernoulli_sampler_forward.1
= control target key start
LH: loop header
LB: loop body
LE: loop exit
PB: predicated region body
PF: predicated region fallthrough
CT: control target
= control target key end

     0   :  { %s1325_s21 = smov 0   ;;  %s1481_s0 = inlined_call_operand.vmem [shape: bf16[256,32], index: 0, kind: input, shape index: {}]   ;;  %s1482_s1 = inlined_call_operand.vmem [shape: bf16[32,128], index: 1, kind: input, shape index: {}]   ;;  %s1483_s2 = inlined_call_operand.vmem [shape: f32[1,128], index: 2, kind: input, shape index: {}]   ;;  %s1484_s3 = inlined_call_operand.vmem [shape: bf16[128,128], index: 3, kind: input, shape index: {}]   ;;  %s1485_s4 = inlined_call_operand.vmem [shape: f32[1,128], index: 4, kind: input, shape index: {}]   ;;  %s1486_s5 = inlined_call_operand.vmem [shape: f32[256,128], index: 5, kind: input, shape index: {}]   ;;  %s1487_s6 = inlined_call_operand.vmem [shape: f32[256,128], index: 6, kind: output, shape index: {}]  }
   0x1 LB: > { %s1021_s22 = sadd.s32 4294967295, %s1287_s21   ;;  %p1025_p0 = scmp.ge.s32.totalorder %s1287_s21, 1  ;;  %s1287_s21 = sphi %s1325_s21, %s16_s21  }
   0x2   : > { %p224_p1 = scmp.lt.s32.totalorder %s1287_s21, 3 }
   0x4   : > { %p225_p2 = pnand %p1025_p0, %p224_p1 }
   0x5   : > { %s1026_s25 = sshll.u32 (!%p225_p2), %s1021_s22, 4 }
   0x6   : > { %228 = sbr.rel (%p225_p2) target bundleno = 449 (0x1c1), region = 44  ;;  %p260_p3 = scmp.lt.s32.totalorder (!%p225_p2), %s1026_s25, 31 }
   0xb   : > { %v1155_v0 = vld [vmem:[%s1482_s1 + $0x8] sm:$0xff]  ;;  %v1154_v1 = vld [vmem:[%s1482_s1] sm:$0xff]  ;;  %s1489_s25 = smov (!%p260_p3, %s1026_s25), 31  ;;  %vm354_vm0 = vcmask 261120   ;;  %v1163_v6 = vld [vmem:[%s1484_s3 + $0x38] sm:$0xff] }
   0xc   : > { %385 = vmatpush.bf16.msra.mxu0 %v1155_v0  ;;  %1164 = vmatpush.bf16.msra.mxu3 %v1155_v0  ;;  %s1027_s28 = sshll.u32 %s1489_s25, 2  ;;  %v1162_v7 = vld [vmem:[%s1484_s3 + $0x30] sm:$0xff]  ;;  %v1161_v8 = vld [vmem:[%s1484_s3 + $0x28] sm:$0xff]  ;;  %v1160_v13 = vld [vmem:[%s1484_s3 + $0x20] sm:$0xff]  ;;  %s1029_s30 = sshll.u32 %s1489_s25, 3 }
   0xd   : > { %s263_s7 = scalar_lea.vmem %s1481_s0, %s1027_s28  ;;  %520 = vmatpush.bf16.msra.mxu1 %v1163_v6  ;;  %1166 = vmatpush.bf16.msra.mxu2 %v1163_v6  ;;  %v1159_v14 = vld [vmem:[%s1484_s3 + $0x18] sm:$0xff]  ;;  %v1158_v15 = vld [vmem:[%s1484_s3 + $0x10] sm:$0xff]  ;;  %v1157_v16 = vld [vmem:[%s1484_s3 + $0x8] sm:$0xff]  ;;  %s1410_s9 = scalar_lea.vmem %s1486_s5, %s1029_s30 }
   0xe   : > { %v1146_v2 = vld [vmem:[%s263_s7] sm:$0xff]  ;;  %v1147_v3 = vld [vmem:[%s263_s7 + $0x8] sm:$0xff]  ;;  %v1148_v4 = vld [vmem:[%s263_s7 + $0x10] sm:$0xff]  ;;  %s1417_s11 = scalar_lea.vmem %s1487_s6, %s1029_s30 }
   0xf   : > { %v1151_v5 = vld [vmem:[%s263_s7 + $0x28] sm:$0xff]  ;;  %v1149_v9 = vld [vmem:[%s263_s7 + $0x18] sm:$0xff]  ;;  %v1152_v10 = vld [vmem:[%s263_s7 + $0x30] sm:$0xff] }
  0x10   : > { %386 = vmatpush.bf16.msra.mxu0 %v1154_v1  ;;  %1165 = vmatpush.bf16.msra.mxu3 %v1154_v1  ;;  %v1150_v11 = vld [vmem:[%s263_s7 + $0x20] sm:$0xff]  ;;  %v1153_v12 = vld [vmem:[%s263_s7 + $0x38] sm:$0xff] }
  0x11   : > { %521 = vmatpush.bf16.msra.mxu1 %v1162_v7  ;;  %1167 = vmatpush.bf16.msra.mxu2 %v1162_v7  ;;  %v1156_v17 = vld [vmem:[%s1484_s3] sm:$0xff] }
  0x12   : > { %v1380_v19 = vld [vmem:[%s1483_s2] ss:$0 sm:$0xff] }
  0x13   : > { %1072 = vmatmul.msk.bf16.vlgmr.msra.gmra.mxu0 %vm354_vm0, %v1146_v2  ;;  %1077 = vmatmul.msk.bf16.vlgmr.msra.gmra.mxu3 %vm354_vm0, %v1151_v5 }
  0x15   : > { %522 = vmatpush.bf16.msra.mxu1 %v1161_v8  ;;  %1168 = vmatpush.bf16.msra.mxu2 %v1161_v8 }
  0x19   : > { %523 = vmatpush.bf16.msra.mxu1 %v1160_v13  ;;  %1169 = vmatpush.bf16.msra.mxu2 %v1160_v13 }
  0x1d   : > { %524 = vmatpush.bf16.msra.mxu1 %v1159_v14  ;;  %1170 = vmatpush.bf16.msra.mxu2 %v1159_v14 }
  0x21   : > { %525 = vmatpush.bf16.msra.mxu1 %v1158_v15  ;;  %1171 = vmatpush.bf16.msra.mxu2 %v1158_v15 }
  0x23   : > { %1073 = vmatmul.msk.bf16.gmra.mxu0 %vm354_vm0, %v1147_v3  ;;  %1078 = vmatmul.msk.bf16.gmra.mxu3 %vm354_vm0, %v1152_v10 }
  0x25   : > { %526 = vmatpush.bf16.msra.mxu1 %v1157_v16  ;;  %1172 = vmatpush.bf16.msra.mxu2 %v1157_v16 }
  0x29   : > { %527 = vmatpush.bf16.msra.mxu1 %v1156_v17  ;;  %1173 = vmatpush.bf16.msra.mxu2 %v1156_v17 }
  0x33   : > { %1074 = vmatmul.msk.bf16.gmra.mxu0 %vm354_vm0, %v1148_v4  ;;  %1079 = vmatmul.msk.bf16.gmra.mxu3 %vm354_vm0, %v1153_v12 }
  0x43   : > { %1075 = vmatmul.msk.bf16.gmra.mxu0 %vm354_vm0, %v1149_v9 }
  0x53   : > { %1076 = vmatmul.msk.bf16.gmra.mxu0 %vm354_vm0, %v1150_v11  ;;  %v1401_v11 = vld [vmem:[%s1485_s4] ss:$0 sm:$0xff] }
  0x90   : > { %v388_v18 = vpop.f32.mrf.mxu0 }
  0x91   : > { %v389_v20 = vadd.f32 %v1380_v19, %v388_v18 }
  0x93   : > { %1185 = vtanh.f32 %v389_v20 }
  0x96   : > { %v413_v46 = vpop.f32.mrf.mxu3 }
  0x97   : > { %v414_v56 = vadd.f32 %v1380_v19, %v413_v46 }
  0x98   : > { %v390_v21 = vpop.f32.mrf.mxu0 }
  0x99   : > { %v391_v22 = vadd.f32 %v1380_v19, %v390_v21  ;;  %v1186_v23 = vpop.eup %1185 }
  0x9b   : > { %1187 = vtanh.f32 %v391_v22 }
  0x9e   : > { %v415_v52 = vpop.f32.mrf.mxu3 }
  0x9f   : > { %v416_v58 = vadd.f32 %v1380_v19, %v415_v52 }
  0xa0   : > { %v393_v24 = vpop.f32.mrf.mxu0 }
  0xa1   : > { %v1188_v25 = vpop.eup %1187  ;;  %v394_v27 = vadd.f32 %v1380_v19, %v393_v24 }
  0xa2   : > { %v444_v26 = vpack.c.bf16 %v1188_v25, %v1186_v23 }
  0xa3   : > { %1189 = vtanh.f32 %v394_v27 }
  0xa4   : > { %528 = vmatmul.bf16.vlgmr.msra.gmra.mxu1 %v444_v26 }
  0xa6   : > { %v418_v57 = vpop.f32.mrf.mxu3 }
  0xa7   : > { %v419_v63 = vadd.f32 %v1380_v19, %v418_v57 }
  0xa8   : > { %v395_v28 = vpop.f32.mrf.mxu0 }
  0xa9   : > { %v396_v29 = vadd.f32 %v1380_v19, %v395_v28  ;;  %v1190_v30 = vpop.eup %1189 }
  0xab   : > { %1191 = vtanh.f32 %v396_v29 }
  0xae   : > { %v420_v60 = vpop.f32.mrf.mxu3 }
  0xaf   : > { %v421_v0 = vadd.f32 %v1380_v19, %v420_v60 }
  0xb0   : > { %v398_v31 = vpop.f32.mrf.mxu0 }
  0xb1   : > { %v1192_v32 = vpop.eup %1191  ;;  %v399_v34 = vadd.f32 %v1380_v19, %v398_v31 }
  0xb2   : > { %v445_v33 = vpack.c.bf16 %v1192_v32, %v1190_v30 }
  0xb3   : > { %1193 = vtanh.f32 %v399_v34 }
  0xb4   : > { %533 = vmatmul.bf16.gmra.mxu1 %v445_v33 }
  0xb6   : > { %v423_v1 = vpop.f32.mrf.mxu3 }
  0xb7   : > { %v424_v6 = vadd.f32 %v1380_v19, %v423_v1 }
  0xb8   : > { %v400_v35 = vpop.f32.mrf.mxu0 }
  0xb9   : > { %v401_v36 = vadd.f32 %v1380_v19, %v400_v35  ;;  %v1194_v37 = vpop.eup %1193 }
  0xbb   : > { %1195 = vtanh.f32 %v401_v36 }
  0xbe   : > { %v425_v4 = vpop.f32.mrf.mxu3 }
  0xbf   : > { %v426_v7 = vadd.f32 %v1380_v19, %v425_v4 }
  0xc0   : > { %v403_v38 = vpop.f32.mrf.mxu0 }
  0xc1   : > { %v1196_v39 = vpop.eup %1195  ;;  %v404_v41 = vadd.f32 %v1380_v19, %v403_v38  ;;  %v873_v38 = vld [vmem:[%s1410_s9] sm:$0xff] }
  0xc2   : > { %v446_v40 = vpack.c.bf16 %v1196_v39, %v1194_v37 }
  0xc3   : > { %1197 = vtanh.f32 %v404_v41 }
  0xc4   : > { %538 = vmatmul.bf16.gmra.mxu1 %v446_v40 }
  0xc8   : > { %v405_v42 = vpop.f32.mrf.mxu0 }
  0xc9   : > { %v406_v43 = vadd.f32 %v1380_v19, %v405_v42  ;;  %v1198_v44 = vpop.eup %1197 }
  0xcb   : > { %1199 = vtanh.f32 %v406_v43 }
  0xd0   : > { %v408_v45 = vpop.f32.mrf.mxu0 }
  0xd1   : > { %v1200_v47 = vpop.eup %1199  ;;  %v409_v49 = vadd.f32 %v1380_v19, %v408_v45 }
  0xd2   : > { %v447_v48 = vpack.c.bf16 %v1200_v47, %v1198_v44  ;;  %v1289_v44 = vmov 0.0  }
  0xd3   : > { %1201 = vtanh.f32 %v409_v49 }
  0xd4   : > { %543 = vmatmul.bf16.gmra.mxu1 %v447_v48 }
  0xd8   : > { %v410_v50 = vpop.f32.mrf.mxu0 }
  0xd9   : > { %v411_v51 = vadd.f32 %v1380_v19, %v410_v50  ;;  %v1202_v53 = vpop.eup %1201 }
  0xdb   : > { %1203 = vtanh.f32 %v411_v51 }
  0xdc   : > { %1205 = vtanh.f32 %v414_v56  ;;  %v874_v56 = vld [vmem:[%s1410_s9 + $0x8] sm:$0xff] }
  0xdd   : > { %1207 = vtanh.f32 %v416_v58 }
  0xde   : > { %1209 = vtanh.f32 %v419_v63 }
  0xdf   : > { %1211 = vtanh.f32 %v421_v0 }
  0xe0   : > { %1213 = vtanh.f32 %v424_v6 }
  0xe1   : > { %v1204_v54 = vpop.eup %1203  ;;  %1215 = vtanh.f32 %v426_v7 }
  0xe2   : > { %v448_v55 = vpack.c.bf16 %v1204_v54, %v1202_v53  ;;  %v1206_v59 = vpop.eup %1205 }
  0xe3   : > { %v1208_v61 = vpop.eup %1207 }
  0xe4   : > { %548 = vmatmul.bf16.vlgmr.msra.gmra.mxu2 %v448_v55  ;;  %v449_v62 = vpack.c.bf16 %v1208_v61, %v1206_v59  ;;  %v1210_v2 = vpop.eup %1209 }
  0xe5   : > { %v1212_v3 = vpop.eup %1211 }
  0xe6   : > { %v450_v5 = vpack.c.bf16 %v1212_v3, %v1210_v2  ;;  %v1214_v8 = vpop.eup %1213 }
  0xe7   : > { %v1216_v9 = vpop.eup %1215 }
  0xe8   : > { %v451_v10 = vpack.c.bf16 %v1216_v9, %v1214_v8  ;;  %v875_v9 = vld [vmem:[%s1410_s9 + $0x10] sm:$0xff] }
  0xf4   : > { %553 = vmatmul.bf16.gmra.mxu2 %v449_v62 }
 0x104   : > { %558 = vmatmul.bf16.gmra.mxu2 %v450_v5 }
 0x114   : > { %563 = vmatmul.bf16.gmra.mxu2 %v451_v10 }
 0x121   : > { %v529_v12 = vpop.f32.mrf.mxu1 }
 0x122   : > { %v530_v13 = vadd.f32 %v1401_v11, %v529_v12 }
 0x124   : > { %v1112_v14 = vmul.f32 -1.442695, %v530_v13 }
 0x126   : > { %1217 = vpow2.f32 %v1112_v14 }
 0x129   : > { %v531_v15 = vpop.f32.mrf.mxu1 }
 0x12a   : > { %v532_v16 = vadd.f32 %v1401_v11, %v531_v15 }
 0x12c   : > { %v1218_v17 = vpop.eup %1217  ;;  %v1113_v18 = vmul.f32 -1.442695, %v532_v16 }
 0x12d   : > { %v617_v19 = vadd.f32 1.0, %v1218_v17 }
 0x12e   : > { %1219 = vpow2.f32 %v1113_v18 }
 0x12f   : > { %1221 = vrcp.f32 %v617_v19  ;;  %v644_v28 = vand.u32 2147483648, %v617_v19  ;;  %v642_v31 = vand.u32 2147483647, %v617_v19  ;;  %vm638_vm2 = vweird.f32 %v617_v19 }
 0x131   : > { %v534_v20 = vpop.f32.mrf.mxu1  ;;  %v645_v37 = vor.u32 1.1754944e-38, %v644_v28  ;;  %vm643_vm4 = vcmp.eq.f32.partialorder %v642_v31, 8.507059e+37 }
 0x132   : > { %v535_v21 = vadd.f32 %v1401_v11, %v534_v20 }
 0x134   : > { %v1220_v22 = vpop.eup %1219  ;;  %v1114_v23 = vmul.f32 -1.442695, %v535_v21 }
 0x135   : > { %v1222_v24 = vpop.eup %1221  ;;  %v618_v25 = vadd.f32 1.0, %v1220_v22 }
 0x136   : > { %v634_v26 = vmul.f32 %v1222_v24, %v617_v19  ;;  %1223 = vpow2.f32 %v1114_v23  ;;  %vm639_vm1 = vweird.f32 %v1222_v24 }
 0x137   : > { %1225 = vrcp.f32 %v618_v25  ;;  %vm640_vm3 = vmor %vm638_vm2, %vm639_vm1  ;;  %v659_v46 = vand.u32 2147483648, %v618_v25  ;;  %v657_v49 = vand.u32 2147483647, %v618_v25  ;;  %vm653_vm7 = vweird.f32 %v618_v25 }
 0x138   : > { %v635_v27 = vsub.f32 1.0, %v634_v26 }
 0x139   : > { %v536_v29 = vpop.f32.mrf.mxu1  ;;  %v660_v55 = vor.u32 1.1754944e-38, %v659_v46  ;;  %vm658_vm9 = vcmp.eq.f32.partialorder %v657_v49, 8.507059e+37 }
 0x13a   : > { %v636_v30 = vmul.f32 %v1222_v24, %v635_v27  ;;  %v537_v32 = vadd.f32 %v1401_v11, %v536_v29  ;;  %v876_v27 = vld [vmem:[%s1410_s9 + $0x18] sm:$0xff] }
 0x13c   : > { %v1224_v33 = vpop.eup %1223  ;;  %v637_v34 = vadd.f32 %v1222_v24, %v636_v30  ;;  %v1115_v35 = vmul.f32 -1.442695, %v537_v32 }
 0x13d   : > { %v1226_v36 = vpop.eup %1225  ;;  %v619_v39 = vadd.f32 1.0, %v1224_v33 }
 0x13e   : > { %v641_v40 = vsel %vm640_vm3, %v1222_v24, %v637_v34  ;;  %v649_v41 = vmul.f32 %v1226_v36, %v618_v25  ;;  %1227 = vpow2.f32 %v1115_v35  ;;  %vm654_vm6 = vweird.f32 %v1226_v36 }
 0x13f   : > { %v646_v42 = vsel %vm643_vm4, %v645_v37, %v641_v40  ;;  %1229 = vrcp.f32 %v619_v39  ;;  %vm655_vm8 = vmor %vm653_vm7, %vm654_vm6  ;;  %v674_v63 = vand.u32 2147483648, %v619_v39  ;;  %v672_v2 = vand.u32 2147483647, %v619_v39 }
 0x140   : > { %vm889_vm5 = vcmp.lt.f32.partialorder %v873_v38, %v646_v42  ;;  %v650_v43 = vsub.f32 1.0, %v649_v41  ;;  %vm668_vm12 = vweird.f32 %v619_v39 }
 0x141   : > { %v1128_v45 = vsel %vm889_vm5, 1.0, %v1289_v44  ;;  %v539_v47 = vpop.f32.mrf.mxu1  ;;  %v675_v8 = vor.u32 1.1754944e-38, %v674_v63  ;;  %vm673_vm14 = vcmp.eq.f32.partialorder %v672_v2, 8.507059e+37 }
 0x142   : > { %937 = vst [vmem:[%s1417_s11] sm:$0xff] %v1128_v45  ;;  %v651_v48 = vmul.f32 %v1226_v36, %v650_v43  ;;  %v540_v50 = vadd.f32 %v1401_v11, %v539_v47  ;;  %v877_v45 = vld [vmem:[%s1410_s9 + $0x20] sm:$0xff] }
 0x144   : > { %v1228_v51 = vpop.eup %1227  ;;  %v652_v52 = vadd.f32 %v1226_v36, %v651_v48  ;;  %v1116_v53 = vmul.f32 -1.442695, %v540_v50 }
 0x145   : > { %v1230_v54 = vpop.eup %1229  ;;  %v620_v57 = vadd.f32 1.0, %v1228_v51 }
 0x146   : > { %v656_v58 = vsel %vm655_vm8, %v1226_v36, %v652_v52  ;;  %v664_v59 = vmul.f32 %v1230_v54, %v619_v39  ;;  %1231 = vpow2.f32 %v1116_v53  ;;  %vm669_vm11 = vweird.f32 %v1230_v54 }
 0x147   : > { %v661_v60 = vsel %vm658_vm9, %v660_v55, %v656_v58  ;;  %1233 = vrcp.f32 %v620_v57  ;;  %vm670_vm13 = vmor %vm668_vm12, %vm669_vm11  ;;  %v689_v17 = vand.u32 2147483648, %v620_v57  ;;  %v687_v20 = vand.u32 2147483647, %v620_v57 }
 0x148   : > { %vm890_vm10 = vcmp.lt.f32.partialorder %v874_v56, %v661_v60  ;;  %v665_v61 = vsub.f32 1.0, %v664_v59  ;;  %vm683_vm1 = vweird.f32 %v620_v57  ;;  %v878_v59 = vld [vmem:[%s1410_s9 + $0x28] sm:$0xff] }
 0x149   : > { %v1129_v62 = vsel %vm890_vm10, 1.0, %v1289_v44  ;;  %v541_v0 = vpop.f32.mrf.mxu1  ;;  %v690_v26 = vor.u32 1.1754944e-38, %v689_v17  ;;  %vm688_vm3 = vcmp.eq.f32.partialorder %v687_v20, 8.507059e+37 }
 0x14a   : > { %938 = vst [vmem:[%s1417_s11 + $0x8] sm:$0xff] %v1129_v62  ;;  %v666_v1 = vmul.f32 %v1230_v54, %v665_v61  ;;  %v542_v3 = vadd.f32 %v1401_v11, %v541_v0 }
 0x14c   : > { %v1232_v4 = vpop.eup %1231  ;;  %v667_v5 = vadd.f32 %v1230_v54, %v666_v1  ;;  %v1117_v6 = vmul.f32 -1.442695, %v542_v3 }
 0x14d   : > { %v1234_v7 = vpop.eup %1233  ;;  %v621_v10 = vadd.f32 1.0, %v1232_v4 }
 0x14e   : > { %v671_v12 = vsel %vm670_vm13, %v1230_v54, %v667_v5  ;;  %v679_v13 = vmul.f32 %v1234_v7, %v620_v57  ;;  %1235 = vpow2.f32 %v1117_v6  ;;  %vm684_vm0 = vweird.f32 %v1234_v7 }
 0x14f   : > { %v676_v14 = vsel %vm673_vm14, %v675_v8, %v671_v12  ;;  %1237 = vrcp.f32 %v621_v10  ;;  %vm685_vm2 = vmor %vm683_vm1, %vm684_vm0  ;;  %v704_v34 = vand.u32 2147483648, %v621_v10  ;;  %v702_v37 = vand.u32 2147483647, %v621_v10  ;;  %v879_v12 = vld [vmem:[%s1410_s9 + $0x30] sm:$0xff] }
 0x150   : > { %vm891_vm15 = vcmp.lt.f32.partialorder %v875_v9, %v676_v14  ;;  %v680_v15 = vsub.f32 1.0, %v679_v13  ;;  %vm698_vm6 = vweird.f32 %v621_v10 }
 0x151   : > { %v1130_v16 = vsel %vm891_vm15, 1.0, %v1289_v44  ;;  %v544_v18 = vpop.f32.mrf.mxu1  ;;  %v705_v43 = vor.u32 1.1754944e-38, %v704_v34  ;;  %vm703_vm8 = vcmp.eq.f32.partialorder %v702_v37, 8.507059e+37 }
 0x152   : > { %939 = vst [vmem:[%s1417_s11 + $0x10] sm:$0xff] %v1130_v16  ;;  %v681_v19 = vmul.f32 %v1234_v7, %v680_v15  ;;  %v545_v21 = vadd.f32 %v1401_v11, %v544_v18 }
 0x154   : > { %v1236_v22 = vpop.eup %1235  ;;  %v682_v23 = vadd.f32 %v1234_v7, %v681_v19  ;;  %v1118_v24 = vmul.f32 -1.442695, %v545_v21 }
 0x155   : > { %v1238_v25 = vpop.eup %1237  ;;  %v622_v28 = vadd.f32 1.0, %v1236_v22 }
 0x156   : > { %v686_v29 = vsel %vm685_vm2, %v1234_v7, %v682_v23  ;;  %v694_v30 = vmul.f32 %v1238_v25, %v621_v10  ;;  %1239 = vpow2.f32 %v1118_v24  ;;  %vm699_vm5 = vweird.f32 %v1238_v25 }
 0x157   : > { %v691_v31 = vsel %vm688_vm3, %v690_v26, %v686_v29  ;;  %1241 = vrcp.f32 %v622_v28  ;;  %vm700_vm7 = vmor %vm698_vm6, %vm699_vm5  ;;  %v719_v52 = vand.u32 2147483648, %v622_v28  ;;  %v717_v54 = vand.u32 2147483647, %v622_v28 }
 0x158   : > { %vm892_vm4 = vcmp.lt.f32.partialorder %v876_v27, %v691_v31  ;;  %v695_v32 = vsub.f32 1.0, %v694_v30  ;;  %vm713_vm11 = vweird.f32 %v622_v28 }
 0x159   : > { %v1131_v33 = vsel %vm892_vm4, 1.0, %v1289_v44  ;;  %v546_v35 = vpop.f32.mrf.mxu1  ;;  %v720_v58 = vor.u32 1.1754944e-38, %v719_v52  ;;  %vm718_vm13 = vcmp.eq.f32.partialorder %v717_v54, 8.507059e+37 }
 0x15a   : > { %940 = vst [vmem:[%s1417_s11 + $0x18] sm:$0xff] %v1131_v33  ;;  %v696_v36 = vmul.f32 %v1238_v25, %v695_v32  ;;  %v547_v38 = vadd.f32 %v1401_v11, %v546_v35 }
 0x15c   : > { %v1240_v39 = vpop.eup %1239  ;;  %v697_v40 = vadd.f32 %v1238_v25, %v696_v36  ;;  %v1119_v41 = vmul.f32 -1.442695, %v547_v38 }
 0x15d   : > { %v1242_v42 = vpop.eup %1241  ;;  %v623_v46 = vadd.f32 1.0, %v1240_v39 }
 0x15e   : > { %v701_v47 = vsel %vm700_vm7, %v1238_v25, %v697_v40  ;;  %v709_v48 = vmul.f32 %v1242_v42, %v622_v28  ;;  %1243 = vpow2.f32 %v1119_v41  ;;  %vm714_vm10 = vweird.f32 %v1242_v42  ;;  %v880_v28 = vld [vmem:[%s1410_s9 + $0x38] sm:$0xff] }
 0x15f   : > { %v706_v49 = vsel %vm703_vm8, %v705_v43, %v701_v47  ;;  %1245 = vrcp.f32 %v623_v46  ;;  %vm715_vm12 = vmor %vm713_vm11, %vm714_vm10  ;;  %v734_v4 = vand.u32 2147483648, %v623_v46  ;;  %v732_v6 = vand.u32 2147483647, %v623_v46 }
 0x160   : > { %vm893_vm9 = vcmp.lt.f32.partialorder %v877_v45, %v706_v49  ;;  %v710_v50 = vsub.f32 1.0, %v709_v48  ;;  %vm728_vm0 = vweird.f32 %v623_v46 }
 0x161   : > { %v1132_v51 = vsel %vm893_vm9, 1.0, %v1289_v44  ;;  %v735_v10 = vor.u32 1.1754944e-38, %v734_v4  ;;  %vm733_vm2 = vcmp.eq.f32.partialorder %v732_v6, 8.507059e+37  ;;  %v882_v4 = vld [vmem:[%s1410_s9 + $0x48] sm:$0xff] }
 0x162   : > { %941 = vst [vmem:[%s1417_s11 + $0x20] sm:$0xff] %v1132_v51  ;;  %v711_v53 = vmul.f32 %v1242_v42, %v710_v50  ;;  %v881_v51 = vld [vmem:[%s1410_s9 + $0x40] sm:$0xff] }
 0x164   : > { %v1244_v55 = vpop.eup %1243  ;;  %v712_v56 = vadd.f32 %v1242_v42, %v711_v53 }
 0x165   : > { %v1246_v57 = vpop.eup %1245  ;;  %v624_v60 = vadd.f32 1.0, %v1244_v55 }
 0x166   : > { %v716_v61 = vsel %vm715_vm12, %v1242_v42, %v712_v56  ;;  %v724_v62 = vmul.f32 %v1246_v57, %v623_v46  ;;  %vm729_vm15 = vweird.f32 %v1246_v57 }
 0x167   : > { %v721_v63 = vsel %vm718_vm13, %v720_v58, %v716_v61  ;;  %1247 = vrcp.f32 %v624_v60  ;;  %v549_v0 = vpop.f32.mrf.mxu2  ;;  %vm730_vm1 = vmor %vm728_vm0, %vm729_vm15  ;;  %v749_v20 = vand.u32 2147483648, %v624_v60  ;;  %v747_v23 = vand.u32 2147483647, %v624_v60 }
 0x168   : > { %vm894_vm14 = vcmp.lt.f32.partialorder %v878_v59, %v721_v63  ;;  %v725_v1 = vsub.f32 1.0, %v724_v62  ;;  %v550_v2 = vadd.f32 %v1401_v11, %v549_v0  ;;  %vm743_vm5 = vweird.f32 %v624_v60 }
 0x169   : > { %v1133_v3 = vsel %vm894_vm14, 1.0, %v1289_v44  ;;  %v750_v27 = vor.u32 1.1754944e-38, %v749_v20  ;;  %vm748_vm7 = vcmp.eq.f32.partialorder %v747_v23, 8.507059e+37 }
 0x16a   : > { %942 = vst [vmem:[%s1417_s11 + $0x28] sm:$0xff] %v1133_v3  ;;  %v726_v5 = vmul.f32 %v1246_v57, %v725_v1  ;;  %v1120_v7 = vmul.f32 -1.442695, %v550_v2 }
 0x16c   : > { %v727_v8 = vadd.f32 %v1246_v57, %v726_v5  ;;  %1249 = vpow2.f32 %v1120_v7 }
 0x16d   : > { %v1248_v9 = vpop.eup %1247 }
 0x16e   : > { %v731_v13 = vsel %vm730_vm1, %v1246_v57, %v727_v8  ;;  %v739_v14 = vmul.f32 %v1248_v9, %v624_v60  ;;  %vm744_vm4 = vweird.f32 %v1248_v9 }
 0x16f   : > { %v736_v15 = vsel %vm733_vm2, %v735_v10, %v731_v13  ;;  %v551_v16 = vpop.f32.mrf.mxu2  ;;  %vm745_vm6 = vmor %vm743_vm5, %vm744_vm4 }
 0x170   : > { %vm895_vm3 = vcmp.lt.f32.partialorder %v879_v12, %v736_v15  ;;  %v740_v17 = vsub.f32 1.0, %v739_v14  ;;  %v552_v18 = vadd.f32 %v1401_v11, %v551_v16 }
 0x171   : > { %v1134_v19 = vsel %vm895_vm3, 1.0, %v1289_v44 }
 0x172   : > { %v1250_v21 = vpop.eup %1249  ;;  %943 = vst [vmem:[%s1417_s11 + $0x30] sm:$0xff] %v1134_v19  ;;  %v741_v22 = vmul.f32 %v1248_v9, %v740_v17  ;;  %v1121_v24 = vmul.f32 -1.442695, %v552_v18 }
 0x173   : > { %v625_v25 = vadd.f32 1.0, %v1250_v21 }
 0x174   : > { %v742_v26 = vadd.f32 %v1248_v9, %v741_v22  ;;  %1251 = vpow2.f32 %v1121_v24  ;;  %v883_v22 = vld [vmem:[%s1410_s9 + $0x50] sm:$0xff] }
 0x175   : > { %1253 = vrcp.f32 %v625_v25  ;;  %v764_v40 = vand.u32 2147483648, %v625_v25  ;;  %v762_v43 = vand.u32 2147483647, %v625_v25  ;;  %vm758_vm10 = vweird.f32 %v625_v25 }
 0x176   : > { %v746_v29 = vsel %vm745_vm6, %v1248_v9, %v742_v26 }
 0x177   : > { %v751_v30 = vsel %vm748_vm7, %v750_v27, %v746_v29  ;;  %v554_v31 = vpop.f32.mrf.mxu2  ;;  %v765_v50 = vor.u32 1.1754944e-38, %v764_v40  ;;  %vm763_vm12 = vcmp.eq.f32.partialorder %v762_v43, 8.507059e+37 }
 0x178   : > { %vm896_vm8 = vcmp.lt.f32.partialorder %v880_v28, %v751_v30  ;;  %v555_v32 = vadd.f32 %v1401_v11, %v554_v31 }
 0x179   : > { %v1135_v33 = vsel %vm896_vm8, 1.0, %v1289_v44 }
 0x17a   : > { %v1252_v34 = vpop.eup %1251  ;;  %944 = vst [vmem:[%s1417_s11 + $0x38] sm:$0xff] %v1135_v33  ;;  %v1122_v35 = vmul.f32 -1.442695, %v555_v32 }
 0x17b   : > { %v1254_v36 = vpop.eup %1253  ;;  %v626_v37 = vadd.f32 1.0, %v1252_v34 }
 0x17c   : > { %v754_v38 = vmul.f32 %v1254_v36, %v625_v25  ;;  %1255 = vpow2.f32 %v1122_v35  ;;  %vm759_vm9 = vweird.f32 %v1254_v36 }
 0x17d   : > { %1257 = vrcp.f32 %v626_v37  ;;  %vm760_vm11 = vmor %vm758_vm10, %vm759_vm9  ;;  %v779_v58 = vand.u32 2147483648, %v626_v37  ;;  %v777_v61 = vand.u32 2147483647, %v626_v37  ;;  %vm773_vm15 = vweird.f32 %v626_v37 }
 0x17e   : > { %v755_v39 = vsub.f32 1.0, %v754_v38 }
 0x17f   : > { %v556_v41 = vpop.f32.mrf.mxu2  ;;  %v780_v3 = vor.u32 1.1754944e-38, %v779_v58  ;;  %vm778_vm1 = vcmp.eq.f32.partialorder %v777_v61, 8.507059e+37 }
 0x180   : > { %v756_v42 = vmul.f32 %v1254_v36, %v755_v39  ;;  %v557_v45 = vadd.f32 %v1401_v11, %v556_v41  ;;  %v884_v39 = vld [vmem:[%s1410_s9 + $0x58] sm:$0xff] }
 0x182   : > { %v1256_v46 = vpop.eup %1255  ;;  %v757_v47 = vadd.f32 %v1254_v36, %v756_v42  ;;  %v1123_v48 = vmul.f32 -1.442695, %v557_v45 }
 0x183   : > { %v1258_v49 = vpop.eup %1257  ;;  %v627_v52 = vadd.f32 1.0, %v1256_v46 }
 0x184   : > { %v761_v53 = vsel %vm760_vm11, %v1254_v36, %v757_v47  ;;  %v769_v54 = vmul.f32 %v1258_v49, %v626_v37  ;;  %1259 = vpow2.f32 %v1123_v48  ;;  %vm774_vm14 = vweird.f32 %v1258_v49 }
 0x185   : > { %v766_v55 = vsel %vm763_vm12, %v765_v50, %v761_v53  ;;  %1261 = vrcp.f32 %v627_v52  ;;  %vm775_vm0 = vmor %vm773_vm15, %vm774_vm14  ;;  %v794_v12 = vand.u32 2147483648, %v627_v52  ;;  %v792_v15 = vand.u32 2147483647, %v627_v52 }
 0x186   : > { %vm897_vm13 = vcmp.lt.f32.partialorder %v881_v51, %v766_v55  ;;  %v770_v56 = vsub.f32 1.0, %v769_v54  ;;  %vm788_vm4 = vweird.f32 %v627_v52 }
 0x187   : > { %v1136_v57 = vsel %vm897_vm13, 1.0, %v1289_v44  ;;  %v559_v59 = vpop.f32.mrf.mxu2  ;;  %v795_v21 = vor.u32 1.1754944e-38, %v794_v12  ;;  %vm793_vm6 = vcmp.eq.f32.partialorder %v792_v15, 8.507059e+37 }
 0x188   : > { %945 = vst [vmem:[%s1417_s11 + $0x40] sm:$0xff] %v1136_v57  ;;  %v771_v60 = vmul.f32 %v1258_v49, %v770_v56  ;;  %v560_v62 = vadd.f32 %v1401_v11, %v559_v59  ;;  %v885_v57 = vld [vmem:[%s1410_s9 + $0x60] sm:$0xff] }
 0x18a   : > { %v1260_v63 = vpop.eup %1259  ;;  %v772_v0 = vadd.f32 %v1258_v49, %v771_v60  ;;  %v1124_v1 = vmul.f32 -1.442695, %v560_v62 }
 0x18b   : > { %v1262_v2 = vpop.eup %1261  ;;  %v628_v5 = vadd.f32 1.0, %v1260_v63 }
 0x18c   : > { %v776_v6 = vsel %vm775_vm0, %v1258_v49, %v772_v0  ;;  %v784_v7 = vmul.f32 %v1262_v2, %v627_v52  ;;  %1263 = vpow2.f32 %v1124_v1  ;;  %vm789_vm3 = vweird.f32 %v1262_v2 }
 0x18d   : > { %v781_v8 = vsel %vm778_vm1, %v780_v3, %v776_v6  ;;  %1265 = vrcp.f32 %v628_v5  ;;  %vm790_vm5 = vmor %vm788_vm4, %vm789_vm3  ;;  %v809_v29 = vand.u32 2147483648, %v628_v5  ;;  %v807_v32 = vand.u32 2147483647, %v628_v5  ;;  %v886_v6 = vld [vmem:[%s1410_s9 + $0x68] sm:$0xff] }
 0x18e   : > { %vm898_vm2 = vcmp.lt.f32.partialorder %v882_v4, %v781_v8  ;;  %v785_v9 = vsub.f32 1.0, %v784_v7  ;;  %vm803_vm9 = vweird.f32 %v628_v5 }
 0x18f   : > { %v1137_v10 = vsel %vm898_vm2, 1.0, %v1289_v44  ;;  %v561_v13 = vpop.f32.mrf.mxu2  ;;  %v810_v38 = vor.u32 1.1754944e-38, %v809_v29  ;;  %vm808_vm11 = vcmp.eq.f32.partialorder %v807_v32, 8.507059e+37 }
 0x190   : > { %946 = vst [vmem:[%s1417_s11 + $0x48] sm:$0xff] %v1137_v10  ;;  %v786_v14 = vmul.f32 %v1262_v2, %v785_v9  ;;  %v562_v16 = vadd.f32 %v1401_v11, %v561_v13 }
 0x192   : > { %v1264_v17 = vpop.eup %1263  ;;  %v787_v18 = vadd.f32 %v1262_v2, %v786_v14  ;;  %v1125_v19 = vmul.f32 -1.442695, %v562_v16 }
 0x193   : > { %v1266_v20 = vpop.eup %1265  ;;  %v629_v23 = vadd.f32 1.0, %v1264_v17 }
 0x194   : > { %v791_v24 = vsel %vm790_vm5, %v1262_v2, %v787_v18  ;;  %v799_v25 = vmul.f32 %v1266_v20, %v628_v5  ;;  %1267 = vpow2.f32 %v1125_v19  ;;  %vm804_vm8 = vweird.f32 %v1266_v20 }
 0x195   : > { %v796_v26 = vsel %vm793_vm6, %v795_v21, %v791_v24  ;;  %1269 = vrcp.f32 %v629_v23  ;;  %vm805_vm10 = vmor %vm803_vm9, %vm804_vm8  ;;  %v824_v47 = vand.u32 2147483648, %v629_v23  ;;  %v822_v50 = vand.u32 2147483647, %v629_v23 }
 0x196   : > { %vm899_vm7 = vcmp.lt.f32.partialorder %v883_v22, %v796_v26  ;;  %v800_v27 = vsub.f32 1.0, %v799_v25  ;;  %vm818_vm14 = vweird.f32 %v629_v23 }
 0x197   : > { %v1138_v28 = vsel %vm899_vm7, 1.0, %v1289_v44  ;;  %v564_v30 = vpop.f32.mrf.mxu2  ;;  %v825_v56 = vor.u32 1.1754944e-38, %v824_v47  ;;  %vm823_vm0 = vcmp.eq.f32.partialorder %v822_v50, 8.507059e+37 }
 0x198   : > { %947 = vst [vmem:[%s1417_s11 + $0x50] sm:$0xff] %v1138_v28  ;;  %v801_v31 = vmul.f32 %v1266_v20, %v800_v27  ;;  %v565_v33 = vadd.f32 %v1401_v11, %v564_v30 }
 0x19a   : > { %v1268_v34 = vpop.eup %1267  ;;  %v802_v35 = vadd.f32 %v1266_v20, %v801_v31  ;;  %v1126_v36 = vmul.f32 -1.442695, %v565_v33  ;;  %v888_v31 = vld [vmem:[%s1410_s9 + $0x78] sm:$0xff] }
 0x19b   : > { %v1270_v37 = vpop.eup %1269  ;;  %v630_v40 = vadd.f32 1.0, %v1268_v34 }
 0x19c   : > { %v806_v41 = vsel %vm805_vm10, %v1266_v20, %v802_v35  ;;  %v814_v42 = vmul.f32 %v1270_v37, %v629_v23  ;;  %1271 = vpow2.f32 %v1126_v36  ;;  %vm819_vm13 = vweird.f32 %v1270_v37  ;;  %v887_v20 = vld [vmem:[%s1410_s9 + $0x70] sm:$0xff] }
 0x19d   : > { %v811_v43 = vsel %vm808_vm11, %v810_v38, %v806_v41  ;;  %1273 = vrcp.f32 %v630_v40  ;;  %vm820_vm15 = vmor %vm818_vm14, %vm819_vm13  ;;  %v839_v63 = vand.u32 2147483648, %v630_v40  ;;  %v837_v1 = vand.u32 2147483647, %v630_v40 }
 0x19e   : > { %vm900_vm12 = vcmp.lt.f32.partialorder %v884_v39, %v811_v43  ;;  %v815_v45 = vsub.f32 1.0, %v814_v42  ;;  %vm833_vm3 = vweird.f32 %v630_v40 }
 0x19f   : > { %v1139_v46 = vsel %vm900_vm12, 1.0, %v1289_v44  ;;  %v566_v48 = vpop.f32.mrf.mxu2  ;;  %v840_v5 = vor.u32 1.1754944e-38, %v839_v63  ;;  %vm838_vm5 = vcmp.eq.f32.partialorder %v837_v1, 8.507059e+37 }
 0x1a0   : > { %948 = vst [vmem:[%s1417_s11 + $0x58] sm:$0xff] %v1139_v46  ;;  %v816_v49 = vmul.f32 %v1270_v37, %v815_v45  ;;  %v567_v51 = vadd.f32 %v1401_v11, %v566_v48 }
 0x1a2   : > { %v1272_v52 = vpop.eup %1271  ;;  %v817_v53 = vadd.f32 %v1270_v37, %v816_v49  ;;  %v1127_v54 = vmul.f32 -1.442695, %v567_v51 }
 0x1a3   : > { %v1274_v55 = vpop.eup %1273  ;;  %v631_v58 = vadd.f32 1.0, %v1272_v52 }
 0x1a4   : > { %v821_v59 = vsel %vm820_vm15, %v1270_v37, %v817_v53  ;;  %v829_v60 = vmul.f32 %v1274_v55, %v630_v40  ;;  %1275 = vpow2.f32 %v1127_v54  ;;  %vm834_vm2 = vweird.f32 %v1274_v55 }
 0x1a5   : > { %v826_v61 = vsel %vm823_vm0, %v825_v56, %v821_v59  ;;  %1277 = vrcp.f32 %v631_v58  ;;  %vm835_vm4 = vmor %vm833_vm3, %vm834_vm2  ;;  %v854_v14 = vand.u32 2147483648, %v631_v58  ;;  %v852_v16 = vand.u32 2147483647, %v631_v58 }
 0x1a6   : > { %vm901_vm1 = vcmp.lt.f32.partialorder %v885_v57, %v826_v61  ;;  %v830_v62 = vsub.f32 1.0, %v829_v60  ;;  %vm848_vm8 = vweird.f32 %v631_v58 }
 0x1a7   : > { %v1140_v11 = vsel %vm901_vm1, 1.0, %v1289_v44  ;;  %v855_v19 = vor.u32 1.1754944e-38, %v854_v14  ;;  %vm853_vm10 = vcmp.eq.f32.partialorder %v852_v16, 8.507059e+37 }
 0x1a8   : > { %949 = vst [vmem:[%s1417_s11 + $0x60] sm:$0xff] %v1140_v11  ;;  %v831_v0 = vmul.f32 %v1274_v55, %v830_v62 }
 0x1aa   : > { %v1276_v2 = vpop.eup %1275  ;;  %v832_v3 = vadd.f32 %v1274_v55, %v831_v0 }
 0x1ab   : > { %v1278_v4 = vpop.eup %1277  ;;  %v632_v7 = vadd.f32 1.0, %v1276_v2 }
 0x1ac   : > { %v836_v8 = vsel %vm835_vm4, %v1274_v55, %v832_v3  ;;  %v844_v9 = vmul.f32 %v1278_v4, %v631_v58  ;;  %vm849_vm7 = vweird.f32 %v1278_v4 }
 0x1ad   : > { %v841_v10 = vsel %vm838_vm5, %v840_v5, %v836_v8  ;;  %1279 = vrcp.f32 %v632_v7  ;;  %vm850_vm9 = vmor %vm848_vm8, %vm849_vm7  ;;  %v869_v26 = vand.u32 2147483648, %v632_v7  ;;  %v867_v28 = vand.u32 2147483647, %v632_v7 }
 0x1ae   : > { %vm902_vm6 = vcmp.lt.f32.partialorder %v886_v6, %v841_v10  ;;  %v845_v12 = vsub.f32 1.0, %v844_v9  ;;  %vm863_vm13 = vweird.f32 %v632_v7 }
 0x1af   : > { %v1141_v13 = vsel %vm902_vm6, 1.0, %v1289_v44  ;;  %v870_v30 = vor.u32 1.1754944e-38, %v869_v26  ;;  %vm868_vm15 = vcmp.eq.f32.partialorder %v867_v28, 8.507059e+37 }
 0x1b0   : > { %950 = vst [vmem:[%s1417_s11 + $0x68] sm:$0xff] %v1141_v13  ;;  %v846_v15 = vmul.f32 %v1278_v4, %v845_v12 }
 0x1b2   : > { %v847_v17 = vadd.f32 %v1278_v4, %v846_v15 }
 0x1b3   : > { %v1280_v18 = vpop.eup %1279 }
 0x1b4   : > { %v851_v21 = vsel %vm850_vm9, %v1278_v4, %v847_v17  ;;  %v859_v22 = vmul.f32 %v1280_v18, %v632_v7  ;;  %vm864_vm12 = vweird.f32 %v1280_v18 }
 0x1b5   : > { %v856_v23 = vsel %vm853_vm10, %v855_v19, %v851_v21  ;;  %vm865_vm14 = vmor %vm863_vm13, %vm864_vm12 }
 0x1b6   : > { %vm903_vm11 = vcmp.lt.f32.partialorder %v887_v20, %v856_v23  ;;  %v860_v24 = vsub.f32 1.0, %v859_v22 }
 0x1b7   : > { %v1142_v25 = vsel %vm903_vm11, 1.0, %v1289_v44 }
 0x1b8   : > { %951 = vst [vmem:[%s1417_s11 + $0x70] sm:$0xff] %v1142_v25  ;;  %v861_v27 = vmul.f32 %v1280_v18, %v860_v24 }
 0x1ba   : > { %v862_v29 = vadd.f32 %v1280_v18, %v861_v27 }
 0x1bc   : > { %v866_v32 = vsel %vm865_vm14, %v1280_v18, %v862_v29 }
 0x1bd   : > { %v871_v33 = vsel %vm868_vm15, %v870_v30, %v866_v32 }
 0x1be   : > { %vm904_vm0 = vcmp.lt.f32.partialorder %v888_v31, %v871_v33 }
 0x1bf   : > { %v1143_v34 = vsel %vm904_vm0, 1.0, %v1289_v44 }
 0x1c0   : > { %952 = vst [vmem:[%s1417_s11 + $0x78] sm:$0xff] %v1143_v34 }
 0x1c1 PF: > { %s16_s21 = sadd.s32 1, %s1287_s21  }
 0x1c2   : > { %p13_p4 = scmp.ge.s32.totalorder %s16_s21, 4  }
 0x1c4   :  { %15 = sbr.rel (!%p13_p4) target bundleno = 1 (0x1), region = 77 }

</bundles_post_ra>
